<compile_context>
chip_gen: v5e
topology: v5e:2x2
jax: 0.10.0
libtpu: 0.0.40
codegen_flags: <defaults>
</compile_context>

<pallas_src>
import jax
import jax.numpy as jnp
from jax import lax
from jax.experimental import pallas as pl
from jax.experimental.pallas import tpu as pltpu


def example_conv_forward(x, weight, bias):
    """Forward of ExampleConv: nn.Conv2d(in_channels, out_channels, k),
    stride=1, padding=0, dilation=1, groups=1, bias=True.

    x:      [N, C, H, W]    float32
    weight: [OC, C, KH, KW] float32
    bias:   [OC]            float32
    returns [N, OC, OH, OW] float32
    """
    N, C, H, W = x.shape
    OC, C2, KH, KW = weight.shape
    assert C2 == C, "groups != 1 not supported by ExampleConv.conv0"
    OH = H - KH + 1
    OW = W - KW + 1
    # Shared per-tap slab length over the flattened (H*W) axis.  For tap
    # (kh, kw) the slice [kh*W + kw, kh*W + kw + L) stays in bounds for all
    # taps, and column j = oh*W + ow of the accumulator holds output (oh, ow).
    L = (OH - 1) * W + OW

    # Free / tiny host-side rearrangements (no HBM pass over activations).
    x2 = x.reshape(N, C, H * W).astype(jnp.float32)                 # view
    w4 = jnp.transpose(weight, (2, 3, 0, 1)).astype(jnp.float32)    # [KH,KW,OC,C]
    b2 = bias.astype(jnp.float32).reshape(OC, 1)

    def kernel(x_ref, w_ref, b_ref, o_ref):
        # x_ref: (1, C, H*W)   one image, VMEM
        # w_ref: (KH, KW, OC, C)  VMEM-resident (constant index_map)
        # b_ref: (OC, 1)          VMEM-resident
        # o_ref: (1, OC, OH, OW)  NCHW output block
        acc = jnp.zeros((OC, L), jnp.float32)
        for kh in range(KH):
            for kw in range(KW):
                xs = x_ref[0, :, pl.ds(kh * W + kw, L)]              # [C, L]
                acc = acc + jnp.dot(w_ref[kh, kw], xs,
                                    preferred_element_type=jnp.float32)
        acc = acc + b_ref[...]                                       # [OC,1] bcast
        # Scatter valid columns (ow < OW of each output row) straight into the
        # NCHW output block; junk columns (ow >= OW) are simply never stored.
        for oh in range(OH):
            o_ref[0, :, oh, :] = acc[:, oh * W:oh * W + OW].astype(o_ref.dtype)

    cost = pl.CostEstimate(
        flops=2 * N * OC * L * C * KH * KW,
        transcendentals=0,
        bytes_accessed=4 * (N * C * H * W + KH * KW * OC * C + OC
                            + N * OC * OH * OW),
    )

    return pl.pallas_call(
        kernel,
        out_shape=jax.ShapeDtypeStruct((N, OC, OH, OW), jnp.float32),
        grid=(N,),
        in_specs=[
            pl.BlockSpec((1, C, H * W), lambda n: (n, 0, 0)),        # image slab
            pl.BlockSpec((KH, KW, OC, C), lambda n: (0, 0, 0, 0)),   # weights
            pl.BlockSpec((OC, 1), lambda n: (0, 0)),                 # bias
        ],
        out_specs=pl.BlockSpec((1, OC, OH, OW), lambda n: (n, 0, 0, 0)),
        compiler_params=pltpu.CompilerParams(
            dimension_semantics=("parallel",),
            vmem_limit_bytes=32 * 1024 * 1024,
        ),
        cost_estimate=cost,
    )(x2, w4, b2)


if __name__ == "__main__":
    key = jax.random.PRNGKey(0)
    kx, kw, kb = jax.random.split(key, 3)

    # Small shapes consistent with the module: Conv2d(4, 8, kernel_size=3)
    N, C, H, W = 2, 4, 16, 16
    OC, KH, KW = 8, 3, 3
    OH, OW = H - KH + 1, W - KW + 1

    x = jax.random.normal(kx, (N, C, H, W), dtype=jnp.float32)

    # Conv2d default bias init: U(-1/sqrt(fan_in), 1/sqrt(fan_in))
    bound = 1.0 / jnp.sqrt(jnp.float32(C * KH * KW))
    bias = jax.random.uniform(kb, (OC,), minval=-bound, maxval=bound,
                              dtype=jnp.float32)

    # --- Check 1: nonzero weight (validates tap accumulation / layouts) ---
    w_rand = jax.random.normal(kw, (OC, C, KH, KW), dtype=jnp.float32) * 0.1
    out = jax.block_until_ready(example_conv_forward(x, w_rand, bias))
    ref = lax.conv_general_dilated(
        x, w_rand, (1, 1), "VALID",
        dimension_numbers=("NCHW", "OIHW", "NCHW"),
        precision=lax.Precision.HIGHEST,
    ) + bias.reshape(1, OC, 1, 1)
    assert out.shape == (N, OC, OH, OW)
    assert jnp.allclose(out, ref, rtol=1e-2, atol=1e-2), \
        "mismatch vs XLA conv reference (nonzero weight)"

    # --- Check 2: module's init_weights(): weight == 0 -> output == bias ---
    w_zero = jnp.zeros((OC, C, KH, KW), dtype=jnp.float32)
    out0 = jax.block_until_ready(example_conv_forward(x, w_zero, bias))
    ref0 = jnp.broadcast_to(bias.reshape(1, OC, 1, 1), (N, OC, OH, OW))
    assert jnp.allclose(out0, ref0, atol=1e-6), \
        "mismatch vs bias broadcast (zero weight, module init)"

    print("KERNEL_OK")
</pallas_src>

<mosaic_0001>
module attributes {stable_mosaic.version = 11 : i64} {
  func.func @kernel(%arg0: i32, %arg1: memref<1x4x256xf32, #tpu.memory_space<vmem>>, %arg2: memref<3x3x8x4xf32, #tpu.memory_space<vmem>>, %arg3: memref<8x1xf32, #tpu.memory_space<vmem>>, %arg4: memref<1x8x14x14xf32, #tpu.memory_space<vmem>>) attributes {dimension_semantics = [#tpu.dimension_semantics<parallel>], iteration_bounds = array<i64: 2>, scalar_prefetch = 0 : i64, scratch_operands = 0 : i64, tpu.core_type = #tpu.core_type<tc>, window_params = [{transform_indices = @transform_0, window_bounds = array<i64: 1, 4, 256>}, {pipeline_mode = #tpu.pipeline_mode<synchronous>, transform_indices = @transform_1, window_bounds = array<i64: 3, 3, 8, 4>}, {pipeline_mode = #tpu.pipeline_mode<synchronous>, transform_indices = @transform_2, window_bounds = array<i64: 8, 1>}, {transform_indices = @transform_3, window_bounds = array<i64: 1, 8, 14, 14>}]} {
    %cst = arith.constant 0.000000e+00 : f32
    %0 = vector.broadcast %cst : f32 to vector<8x222xf32>
    %c0 = arith.constant 0 : index
    %c0_0 = arith.constant 0 : index
    %c0_1 = arith.constant 0 : index
    %1 = vector.load %arg1[%c0, %c0_0, %c0_1] : memref<1x4x256xf32, #tpu.memory_space<vmem>>, vector<1x4x222xf32>
    %2 = vector.shape_cast %1 : vector<1x4x222xf32> to vector<4x222xf32>
    %c0_2 = arith.constant 0 : index
    %c0_3 = arith.constant 0 : index
    %c0_4 = arith.constant 0 : index
    %c0_5 = arith.constant 0 : index
    %3 = vector.load %arg2[%c0_2, %c0_3, %c0_4, %c0_5] : memref<3x3x8x4xf32, #tpu.memory_space<vmem>>, vector<1x1x8x4xf32>
    %4 = vector.shape_cast %3 : vector<1x1x8x4xf32> to vector<8x4xf32>
    %cst_6 = arith.constant dense<0.000000e+00> : vector<8x222xf32>
    %5 = tpu.matmul %4, %2, %cst_6 {dimension_numbers = #tpu.dot_dimension_numbers<[1], [0], [0], [1], [0, 0, 1, 1], [], []>} : vector<8x4xf32>, vector<4x222xf32>, vector<8x222xf32> -> vector<8x222xf32>
    %6 = arith.addf %0, %5 : vector<8x222xf32>
    %c0_7 = arith.constant 0 : index
    %c0_8 = arith.constant 0 : index
    %c1 = arith.constant 1 : index
    %7 = vector.load %arg1[%c0_7, %c0_8, %c1] : memref<1x4x256xf32, #tpu.memory_space<vmem>>, vector<1x4x222xf32>
    %8 = vector.shape_cast %7 : vector<1x4x222xf32> to vector<4x222xf32>
    %c0_9 = arith.constant 0 : index
    %c1_10 = arith.constant 1 : index
    %c0_11 = arith.constant 0 : index
    %c0_12 = arith.constant 0 : index
    %9 = vector.load %arg2[%c0_9, %c1_10, %c0_11, %c0_12] : memref<3x3x8x4xf32, #tpu.memory_space<vmem>>, vector<1x1x8x4xf32>
    %10 = vector.shape_cast %9 : vector<1x1x8x4xf32> to vector<8x4xf32>
    %cst_13 = arith.constant dense<0.000000e+00> : vector<8x222xf32>
    %11 = tpu.matmul %10, %8, %cst_13 {dimension_numbers = #tpu.dot_dimension_numbers<[1], [0], [0], [1], [0, 0, 1, 1], [], []>} : vector<8x4xf32>, vector<4x222xf32>, vector<8x222xf32> -> vector<8x222xf32>
    %12 = arith.addf %6, %11 : vector<8x222xf32>
    %c0_14 = arith.constant 0 : index
    %c0_15 = arith.constant 0 : index
    %c2 = arith.constant 2 : index
    %13 = vector.load %arg1[%c0_14, %c0_15, %c2] : memref<1x4x256xf32, #tpu.memory_space<vmem>>, vector<1x4x222xf32>
    %14 = vector.shape_cast %13 : vector<1x4x222xf32> to vector<4x222xf32>
    %c0_16 = arith.constant 0 : index
    %c2_17 = arith.constant 2 : index
    %c0_18 = arith.constant 0 : index
    %c0_19 = arith.constant 0 : index
    %15 = vector.load %arg2[%c0_16, %c2_17, %c0_18, %c0_19] : memref<3x3x8x4xf32, #tpu.memory_space<vmem>>, vector<1x1x8x4xf32>
    %16 = vector.shape_cast %15 : vector<1x1x8x4xf32> to vector<8x4xf32>
    %cst_20 = arith.constant dense<0.000000e+00> : vector<8x222xf32>
    %17 = tpu.matmul %16, %14, %cst_20 {dimension_numbers = #tpu.dot_dimension_numbers<[1], [0], [0], [1], [0, 0, 1, 1], [], []>} : vector<8x4xf32>, vector<4x222xf32>, vector<8x222xf32> -> vector<8x222xf32>
    %18 = arith.addf %12, %17 : vector<8x222xf32>
    %c0_21 = arith.constant 0 : index
    %c0_22 = arith.constant 0 : index
    %c16 = arith.constant 16 : index
    %19 = vector.load %arg1[%c0_21, %c0_22, %c16] : memref<1x4x256xf32, #tpu.memory_space<vmem>>, vector<1x4x222xf32>
    %20 = vector.shape_cast %19 : vector<1x4x222xf32> to vector<4x222xf32>
    %c1_23 = arith.constant 1 : index
    %c0_24 = arith.constant 0 : index
    %c0_25 = arith.constant 0 : index
    %c0_26 = arith.constant 0 : index
    %21 = vector.load %arg2[%c1_23, %c0_24, %c0_25, %c0_26] : memref<3x3x8x4xf32, #tpu.memory_space<vmem>>, vector<1x1x8x4xf32>
    %22 = vector.shape_cast %21 : vector<1x1x8x4xf32> to vector<8x4xf32>
    %cst_27 = arith.constant dense<0.000000e+00> : vector<8x222xf32>
    %23 = tpu.matmul %22, %20, %cst_27 {dimension_numbers = #tpu.dot_dimension_numbers<[1], [0], [0], [1], [0, 0, 1, 1], [], []>} : vector<8x4xf32>, vector<4x222xf32>, vector<8x222xf32> -> vector<8x222xf32>
    %24 = arith.addf %18, %23 : vector<8x222xf32>
    %c0_28 = arith.constant 0 : index
    %c0_29 = arith.constant 0 : index
    %c17 = arith.constant 17 : index
    %25 = vector.load %arg1[%c0_28, %c0_29, %c17] : memref<1x4x256xf32, #tpu.memory_space<vmem>>, vector<1x4x222xf32>
    %26 = vector.shape_cast %25 : vector<1x4x222xf32> to vector<4x222xf32>
    %c1_30 = arith.constant 1 : index
    %c1_31 = arith.constant 1 : index
    %c0_32 = arith.constant 0 : index
    %c0_33 = arith.constant 0 : index
    %27 = vector.load %arg2[%c1_30, %c1_31, %c0_32, %c0_33] : memref<3x3x8x4xf32, #tpu.memory_space<vmem>>, vector<1x1x8x4xf32>
    %28 = vector.shape_cast %27 : vector<1x1x8x4xf32> to vector<8x4xf32>
    %cst_34 = arith.constant dense<0.000000e+00> : vector<8x222xf32>
    %29 = tpu.matmul %28, %26, %cst_34 {dimension_numbers = #tpu.dot_dimension_numbers<[1], [0], [0], [1], [0, 0, 1, 1], [], []>} : vector<8x4xf32>, vector<4x222xf32>, vector<8x222xf32> -> vector<8x222xf32>
    %30 = arith.addf %24, %29 : vector<8x222xf32>
    %c0_35 = arith.constant 0 : index
    %c0_36 = arith.constant 0 : index
    %c18 = arith.constant 18 : index
    %31 = vector.load %arg1[%c0_35, %c0_36, %c18] : memref<1x4x256xf32, #tpu.memory_space<vmem>>, vector<1x4x222xf32>
    %32 = vector.shape_cast %31 : vector<1x4x222xf32> to vector<4x222xf32>
    %c1_37 = arith.constant 1 : index
    %c2_38 = arith.constant 2 : index
    %c0_39 = arith.constant 0 : index
    %c0_40 = arith.constant 0 : index
    %33 = vector.load %arg2[%c1_37, %c2_38, %c0_39, %c0_40] : memref<3x3x8x4xf32, #tpu.memory_space<vmem>>, vector<1x1x8x4xf32>
    %34 = vector.shape_cast %33 : vector<1x1x8x4xf32> to vector<8x4xf32>
    %cst_41 = arith.constant dense<0.000000e+00> : vector<8x222xf32>
    %35 = tpu.matmul %34, %32, %cst_41 {dimension_numbers = #tpu.dot_dimension_numbers<[1], [0], [0], [1], [0, 0, 1, 1], [], []>} : vector<8x4xf32>, vector<4x222xf32>, vector<8x222xf32> -> vector<8x222xf32>
    %36 = arith.addf %30, %35 : vector<8x222xf32>
    %c0_42 = arith.constant 0 : index
    %c0_43 = arith.constant 0 : index
    %c32 = arith.constant 32 : index
    %37 = vector.load %arg1[%c0_42, %c0_43, %c32] : memref<1x4x256xf32, #tpu.memory_space<vmem>>, vector<1x4x222xf32>
    %38 = vector.shape_cast %37 : vector<1x4x222xf32> to vector<4x222xf32>
    %c2_44 = arith.constant 2 : index
    %c0_45 = arith.constant 0 : index
    %c0_46 = arith.constant 0 : index
    %c0_47 = arith.constant 0 : index
    %39 = vector.load %arg2[%c2_44, %c0_45, %c0_46, %c0_47] : memref<3x3x8x4xf32, #tpu.memory_space<vmem>>, vector<1x1x8x4xf32>
    %40 = vector.shape_cast %39 : vector<1x1x8x4xf32> to vector<8x4xf32>
    %cst_48 = arith.constant dense<0.000000e+00> : vector<8x222xf32>
    %41 = tpu.matmul %40, %38, %cst_48 {dimension_numbers = #tpu.dot_dimension_numbers<[1], [0], [0], [1], [0, 0, 1, 1], [], []>} : vector<8x4xf32>, vector<4x222xf32>, vector<8x222xf32> -> vector<8x222xf32>
    %42 = arith.addf %36, %41 : vector<8x222xf32>
    %c0_49 = arith.constant 0 : index
    %c0_50 = arith.constant 0 : index
    %c33 = arith.constant 33 : index
    %43 = vector.load %arg1[%c0_49, %c0_50, %c33] : memref<1x4x256xf32, #tpu.memory_space<vmem>>, vector<1x4x222xf32>
    %44 = vector.shape_cast %43 : vector<1x4x222xf32> to vector<4x222xf32>
    %c2_51 = arith.constant 2 : index
    %c1_52 = arith.constant 1 : index
    %c0_53 = arith.constant 0 : index
    %c0_54 = arith.constant 0 : index
    %45 = vector.load %arg2[%c2_51, %c1_52, %c0_53, %c0_54] : memref<3x3x8x4xf32, #tpu.memory_space<vmem>>, vector<1x1x8x4xf32>
    %46 = vector.shape_cast %45 : vector<1x1x8x4xf32> to vector<8x4xf32>
    %cst_55 = arith.constant dense<0.000000e+00> : vector<8x222xf32>
    %47 = tpu.matmul %46, %44, %cst_55 {dimension_numbers = #tpu.dot_dimension_numbers<[1], [0], [0], [1], [0, 0, 1, 1], [], []>} : vector<8x4xf32>, vector<4x222xf32>, vector<8x222xf32> -> vector<8x222xf32>
    %48 = arith.addf %42, %47 : vector<8x222xf32>
    %c0_56 = arith.constant 0 : index
    %c0_57 = arith.constant 0 : index
    %c34 = arith.constant 34 : index
    %49 = vector.load %arg1[%c0_56, %c0_57, %c34] : memref<1x4x256xf32, #tpu.memory_space<vmem>>, vector<1x4x222xf32>
    %50 = vector.shape_cast %49 : vector<1x4x222xf32> to vector<4x222xf32>
    %c2_58 = arith.constant 2 : index
    %c2_59 = arith.constant 2 : index
    %c0_60 = arith.constant 0 : index
    %c0_61 = arith.constant 0 : index
    %51 = vector.load %arg2[%c2_58, %c2_59, %c0_60, %c0_61] : memref<3x3x8x4xf32, #tpu.memory_space<vmem>>, vector<1x1x8x4xf32>
    %52 = vector.shape_cast %51 : vector<1x1x8x4xf32> to vector<8x4xf32>
    %cst_62 = arith.constant dense<0.000000e+00> : vector<8x222xf32>
    %53 = tpu.matmul %52, %50, %cst_62 {dimension_numbers = #tpu.dot_dimension_numbers<[1], [0], [0], [1], [0, 0, 1, 1], [], []>} : vector<8x4xf32>, vector<4x222xf32>, vector<8x222xf32> -> vector<8x222xf32>
    %54 = arith.addf %48, %53 : vector<8x222xf32>
    %c0_63 = arith.constant 0 : index
    %c0_64 = arith.constant 0 : index
    %55 = vector.load %arg3[%c0_63, %c0_64] : memref<8x1xf32, #tpu.memory_space<vmem>>, vector<8x1xf32>
    %56 = vector.broadcast %55 : vector<8x1xf32> to vector<8x222xf32>
    %57 = arith.addf %54, %56 : vector<8x222xf32>
    %58 = vector.extract_strided_slice %57 {offsets = [0, 0], sizes = [8, 14], strides = [1, 1]} : vector<8x222xf32> to vector<8x14xf32>
    %c0_65 = arith.constant 0 : index
    %c0_66 = arith.constant 0 : index
    %c0_67 = arith.constant 0 : index
    %c0_68 = arith.constant 0 : index
    %59 = vector.load %arg4[%c0_65, %c0_66, %c0_67, %c0_68] : memref<1x8x14x14xf32, #tpu.memory_space<vmem>>, vector<1x8x1x14xf32>
    %60 = vector.shape_cast %59 : vector<1x8x1x14xf32> to vector<8x14xf32>
    %61 = vector.shape_cast %58 : vector<8x14xf32> to vector<1x8x1x14xf32>
    tpu.vector_store %arg4[%c0_65, %c0_66, %c0_67, %c0_68], %61 {strides = array<i32>} : memref<1x8x14x14xf32, #tpu.memory_space<vmem>>, vector<1x8x1x14xf32>,
    %62 = vector.extract_strided_slice %57 {offsets = [0, 16], sizes = [8, 14], strides = [1, 1]} : vector<8x222xf32> to vector<8x14xf32>
    %c0_69 = arith.constant 0 : index
    %c0_70 = arith.constant 0 : index
    %c1_71 = arith.constant 1 : index
    %c0_72 = arith.constant 0 : index
    %63 = vector.load %arg4[%c0_69, %c0_70, %c1_71, %c0_72] : memref<1x8x14x14xf32, #tpu.memory_space<vmem>>, vector<1x8x1x14xf32>
    %64 = vector.shape_cast %63 : vector<1x8x1x14xf32> to vector<8x14xf32>
    %65 = vector.shape_cast %62 : vector<8x14xf32> to vector<1x8x1x14xf32>
    tpu.vector_store %arg4[%c0_69, %c0_70, %c1_71, %c0_72], %65 {strides = array<i32>} : memref<1x8x14x14xf32, #tpu.memory_space<vmem>>, vector<1x8x1x14xf32>,
    %66 = vector.extract_strided_slice %57 {offsets = [0, 32], sizes = [8, 14], strides = [1, 1]} : vector<8x222xf32> to vector<8x14xf32>
    %c0_73 = arith.constant 0 : index
    %c0_74 = arith.constant 0 : index
    %c2_75 = arith.constant 2 : index
    %c0_76 = arith.constant 0 : index
    %67 = vector.load %arg4[%c0_73, %c0_74, %c2_75, %c0_76] : memref<1x8x14x14xf32, #tpu.memory_space<vmem>>, vector<1x8x1x14xf32>
    %68 = vector.shape_cast %67 : vector<1x8x1x14xf32> to vector<8x14xf32>
    %69 = vector.shape_cast %66 : vector<8x14xf32> to vector<1x8x1x14xf32>
    tpu.vector_store %arg4[%c0_73, %c0_74, %c2_75, %c0_76], %69 {strides = array<i32>} : memref<1x8x14x14xf32, #tpu.memory_space<vmem>>, vector<1x8x1x14xf32>,
    %70 = vector.extract_strided_slice %57 {offsets = [0, 48], sizes = [8, 14], strides = [1, 1]} : vector<8x222xf32> to vector<8x14xf32>
    %c0_77 = arith.constant 0 : index
    %c0_78 = arith.constant 0 : index
    %c3 = arith.constant 3 : index
    %c0_79 = arith.constant 0 : index
    %71 = vector.load %arg4[%c0_77, %c0_78, %c3, %c0_79] : memref<1x8x14x14xf32, #tpu.memory_space<vmem>>, vector<1x8x1x14xf32>
    %72 = vector.shape_cast %71 : vector<1x8x1x14xf32> to vector<8x14xf32>
    %73 = vector.shape_cast %70 : vector<8x14xf32> to vector<1x8x1x14xf32>
    tpu.vector_store %arg4[%c0_77, %c0_78, %c3, %c0_79], %73 {strides = array<i32>} : memref<1x8x14x14xf32, #tpu.memory_space<vmem>>, vector<1x8x1x14xf32>,
    %74 = vector.extract_strided_slice %57 {offsets = [0, 64], sizes = [8, 14], strides = [1, 1]} : vector<8x222xf32> to vector<8x14xf32>
    %c0_80 = arith.constant 0 : index
    %c0_81 = arith.constant 0 : index
    %c4 = arith.constant 4 : index
    %c0_82 = arith.constant 0 : index
    %75 = vector.load %arg4[%c0_80, %c0_81, %c4, %c0_82] : memref<1x8x14x14xf32, #tpu.memory_space<vmem>>, vector<1x8x1x14xf32>
    %76 = vector.shape_cast %75 : vector<1x8x1x14xf32> to vector<8x14xf32>
    %77 = vector.shape_cast %74 : vector<8x14xf32> to vector<1x8x1x14xf32>
    tpu.vector_store %arg4[%c0_80, %c0_81, %c4, %c0_82], %77 {strides = array<i32>} : memref<1x8x14x14xf32, #tpu.memory_space<vmem>>, vector<1x8x1x14xf32>,
    %78 = vector.extract_strided_slice %57 {offsets = [0, 80], sizes = [8, 14], strides = [1, 1]} : vector<8x222xf32> to vector<8x14xf32>
    %c0_83 = arith.constant 0 : index
    %c0_84 = arith.constant 0 : index
    %c5 = arith.constant 5 : index
    %c0_85 = arith.constant 0 : index
    %79 = vector.load %arg4[%c0_83, %c0_84, %c5, %c0_85] : memref<1x8x14x14xf32, #tpu.memory_space<vmem>>, vector<1x8x1x14xf32>
    %80 = vector.shape_cast %79 : vector<1x8x1x14xf32> to vector<8x14xf32>
    %81 = vector.shape_cast %78 : vector<8x14xf32> to vector<1x8x1x14xf32>
    tpu.vector_store %arg4[%c0_83, %c0_84, %c5, %c0_85], %81 {strides = array<i32>} : memref<1x8x14x14xf32, #tpu.memory_space<vmem>>, vector<1x8x1x14xf32>,
    %82 = vector.extract_strided_slice %57 {offsets = [0, 96], sizes = [8, 14], strides = [1, 1]} : vector<8x222xf32> to vector<8x14xf32>
    %c0_86 = arith.constant 0 : index
    %c0_87 = arith.constant 0 : index
    %c6 = arith.constant 6 : index
    %c0_88 = arith.constant 0 : index
    %83 = vector.load %arg4[%c0_86, %c0_87, %c6, %c0_88] : memref<1x8x14x14xf32, #tpu.memory_space<vmem>>, vector<1x8x1x14xf32>
    %84 = vector.shape_cast %83 : vector<1x8x1x14xf32> to vector<8x14xf32>
    %85 = vector.shape_cast %82 : vector<8x14xf32> to vector<1x8x1x14xf32>
    tpu.vector_store %arg4[%c0_86, %c0_87, %c6, %c0_88], %85 {strides = array<i32>} : memref<1x8x14x14xf32, #tpu.memory_space<vmem>>, vector<1x8x1x14xf32>,
    %86 = vector.extract_strided_slice %57 {offsets = [0, 112], sizes = [8, 14], strides = [1, 1]} : vector<8x222xf32> to vector<8x14xf32>
    %c0_89 = arith.constant 0 : index
    %c0_90 = arith.constant 0 : index
    %c7 = arith.constant 7 : index
    %c0_91 = arith.constant 0 : index
    %87 = vector.load %arg4[%c0_89, %c0_90, %c7, %c0_91] : memref<1x8x14x14xf32, #tpu.memory_space<vmem>>, vector<1x8x1x14xf32>
    %88 = vector.shape_cast %87 : vector<1x8x1x14xf32> to vector<8x14xf32>
    %89 = vector.shape_cast %86 : vector<8x14xf32> to vector<1x8x1x14xf32>
    tpu.vector_store %arg4[%c0_89, %c0_90, %c7, %c0_91], %89 {strides = array<i32>} : memref<1x8x14x14xf32, #tpu.memory_space<vmem>>, vector<1x8x1x14xf32>,
    %90 = vector.extract_strided_slice %57 {offsets = [0, 128], sizes = [8, 14], strides = [1, 1]} : vector<8x222xf32> to vector<8x14xf32>
    %c0_92 = arith.constant 0 : index
    %c0_93 = arith.constant 0 : index
    %c8 = arith.constant 8 : index
    %c0_94 = arith.constant 0 : index
    %91 = vector.load %arg4[%c0_92, %c0_93, %c8, %c0_94] : memref<1x8x14x14xf32, #tpu.memory_space<vmem>>, vector<1x8x1x14xf32>
    %92 = vector.shape_cast %91 : vector<1x8x1x14xf32> to vector<8x14xf32>
    %93 = vector.shape_cast %90 : vector<8x14xf32> to vector<1x8x1x14xf32>
    tpu.vector_store %arg4[%c0_92, %c0_93, %c8, %c0_94], %93 {strides = array<i32>} : memref<1x8x14x14xf32, #tpu.memory_space<vmem>>, vector<1x8x1x14xf32>,
    %94 = vector.extract_strided_slice %57 {offsets = [0, 144], sizes = [8, 14], strides = [1, 1]} : vector<8x222xf32> to vector<8x14xf32>
    %c0_95 = arith.constant 0 : index
    %c0_96 = arith.constant 0 : index
    %c9 = arith.constant 9 : index
    %c0_97 = arith.constant 0 : index
    %95 = vector.load %arg4[%c0_95, %c0_96, %c9, %c0_97] : memref<1x8x14x14xf32, #tpu.memory_space<vmem>>, vector<1x8x1x14xf32>
    %96 = vector.shape_cast %95 : vector<1x8x1x14xf32> to vector<8x14xf32>
    %97 = vector.shape_cast %94 : vector<8x14xf32> to vector<1x8x1x14xf32>
    tpu.vector_store %arg4[%c0_95, %c0_96, %c9, %c0_97], %97 {strides = array<i32>} : memref<1x8x14x14xf32, #tpu.memory_space<vmem>>, vector<1x8x1x14xf32>,
    %98 = vector.extract_strided_slice %57 {offsets = [0, 160], sizes = [8, 14], strides = [1, 1]} : vector<8x222xf32> to vector<8x14xf32>
    %c0_98 = arith.constant 0 : index
    %c0_99 = arith.constant 0 : index
    %c10 = arith.constant 10 : index
    %c0_100 = arith.constant 0 : index
    %99 = vector.load %arg4[%c0_98, %c0_99, %c10, %c0_100] : memref<1x8x14x14xf32, #tpu.memory_space<vmem>>, vector<1x8x1x14xf32>
    %100 = vector.shape_cast %99 : vector<1x8x1x14xf32> to vector<8x14xf32>
    %101 = vector.shape_cast %98 : vector<8x14xf32> to vector<1x8x1x14xf32>
    tpu.vector_store %arg4[%c0_98, %c0_99, %c10, %c0_100], %101 {strides = array<i32>} : memref<1x8x14x14xf32, #tpu.memory_space<vmem>>, vector<1x8x1x14xf32>,
    %102 = vector.extract_strided_slice %57 {offsets = [0, 176], sizes = [8, 14], strides = [1, 1]} : vector<8x222xf32> to vector<8x14xf32>
    %c0_101 = arith.constant 0 : index
    %c0_102 = arith.constant 0 : index
    %c11 = arith.constant 11 : index
    %c0_103 = arith.constant 0 : index
    %103 = vector.load %arg4[%c0_101, %c0_102, %c11, %c0_103] : memref<1x8x14x14xf32, #tpu.memory_space<vmem>>, vector<1x8x1x14xf32>
    %104 = vector.shape_cast %103 : vector<1x8x1x14xf32> to vector<8x14xf32>
    %105 = vector.shape_cast %102 : vector<8x14xf32> to vector<1x8x1x14xf32>
    tpu.vector_store %arg4[%c0_101, %c0_102, %c11, %c0_103], %105 {strides = array<i32>} : memref<1x8x14x14xf32, #tpu.memory_space<vmem>>, vector<1x8x1x14xf32>,
    %106 = vector.extract_strided_slice %57 {offsets = [0, 192], sizes = [8, 14], strides = [1, 1]} : vector<8x222xf32> to vector<8x14xf32>
    %c0_104 = arith.constant 0 : index
    %c0_105 = arith.constant 0 : index
    %c12 = arith.constant 12 : index
    %c0_106 = arith.constant 0 : index
    %107 = vector.load %arg4[%c0_104, %c0_105, %c12, %c0_106] : memref<1x8x14x14xf32, #tpu.memory_space<vmem>>, vector<1x8x1x14xf32>
    %108 = vector.shape_cast %107 : vector<1x8x1x14xf32> to vector<8x14xf32>
    %109 = vector.shape_cast %106 : vector<8x14xf32> to vector<1x8x1x14xf32>
    tpu.vector_store %arg4[%c0_104, %c0_105, %c12, %c0_106], %109 {strides = array<i32>} : memref<1x8x14x14xf32, #tpu.memory_space<vmem>>, vector<1x8x1x14xf32>,
    %110 = vector.extract_strided_slice %57 {offsets = [0, 208], sizes = [8, 14], strides = [1, 1]} : vector<8x222xf32> to vector<8x14xf32>
    %c0_107 = arith.constant 0 : index
    %c0_108 = arith.constant 0 : index
    %c13 = arith.constant 13 : index
    %c0_109 = arith.constant 0 : index
    %111 = vector.load %arg4[%c0_107, %c0_108, %c13, %c0_109] : memref<1x8x14x14xf32, #tpu.memory_space<vmem>>, vector<1x8x1x14xf32>
    %112 = vector.shape_cast %111 : vector<1x8x1x14xf32> to vector<8x14xf32>
    %113 = vector.shape_cast %110 : vector<8x14xf32> to vector<1x8x1x14xf32>
    tpu.vector_store %arg4[%c0_107, %c0_108, %c13, %c0_109], %113 {strides = array<i32>} : memref<1x8x14x14xf32, #tpu.memory_space<vmem>>, vector<1x8x1x14xf32>,
    return
  }
  func.func @transform_0(%arg0: i32) -> (i32, i32, i32) {
    %c0_i32 = arith.constant 0 : i32
    %c0_i32_0 = arith.constant 0 : i32
    %c0_i32_1 = arith.constant 0 : i32
    return %arg0, %c0_i32, %c0_i32_0 : i32, i32, i32
  }
  func.func @transform_1(%arg0: i32) -> (i32, i32, i32, i32) {
    %c0_i32 = arith.constant 0 : i32
    %c0_i32_0 = arith.constant 0 : i32
    %c0_i32_1 = arith.constant 0 : i32
    %c0_i32_2 = arith.constant 0 : i32
    %c0_i32_3 = arith.constant 0 : i32
    return %c0_i32, %c0_i32_0, %c0_i32_1, %c0_i32_2 : i32, i32, i32, i32
  }
  func.func @transform_2(%arg0: i32) -> (i32, i32) {
    %c0_i32 = arith.constant 0 : i32
    %c0_i32_0 = arith.constant 0 : i32
    %c0_i32_1 = arith.constant 0 : i32
    return %c0_i32, %c0_i32_0 : i32, i32
  }
  func.func @transform_3(%arg0: i32) -> (i32, i32, i32, i32) {
    %c0_i32 = arith.constant 0 : i32
    %c0_i32_0 = arith.constant 0 : i32
    %c0_i32_1 = arith.constant 0 : i32
    %c0_i32_2 = arith.constant 0 : i32
    return %arg0, %c0_i32, %c0_i32_0, %c0_i32_1 : i32, i32, i32, i32
  }
}

</mosaic_0001>

<bundles_post_ra>
// kernel: tpu_custom_call.1
= control target key start
LH: loop header
LB: loop body
LE: loop exit
PB: predicated region body
PF: predicated region fallthrough
CT: control target
= control target key end

     0   :  { %s1351_s12 = smov 0   ;;  %s1902_s0 = inlined_call_operand.vmem [shape: f32[2,4,256], index: 0, kind: input, shape index: {}]   ;;  %s1903_s1 = inlined_call_operand.vmem [shape: f32[3,3,8,4], index: 1, kind: input, shape index: {}]   ;;  %s1904_s2 = inlined_call_operand.vmem [shape: f32[8,1], index: 2, kind: input, shape index: {}]   ;;  %s1905_s3 = inlined_call_operand.vmem [shape: f32[2,8,14,14], index: 3, kind: output, shape index: {}]  }
   0x1 LB: > { %s1228_s13 = sadd.s32 4294967295, %s1315_s12   ;;  %p1232_p0 = scmp.ge.s32.totalorder %s1315_s12, 1  ;;  %s1315_s12 = sphi %s1351_s12, %s13_s12  }
   0x2   : > { %p137_p1 = scmp.lt.s32.totalorder %s1315_s12, 3 }
   0x4   : > { %p138_p2 = pnand %p1232_p0, %p137_p1 }
   0x5   : > { %p161_p3 = scmp.lt.s32.totalorder (!%p138_p2), %s1228_s13, 1  ;;  %s1318_s20 = smov (!%p138_p2), 127  }
   0x6   : > { %141 = sbr.rel (%p138_p2) target bundleno = 700 (0x2bc), region = 32  ;;  %s1319_s21 = smov (!%p138_p2), 126  }
   0x7   : > { %s1320_s22 = smov (!%p138_p2), 112   ;;  %s1321_s23 = smov (!%p138_p2), 111  }
   0x8   : > { %s1322_s24 = smov (!%p138_p2), 110   ;;  %s1323_s25 = smov (!%p138_p2), 96  }
   0x9   : > { %s1324_s26 = smov (!%p138_p2), 95   ;;  %s1325_s27 = smov (!%p138_p2), 94  }
   0xa   : > { %s1328_s28 = smov (!%p138_p2), 64   ;;  %s1329_s29 = smov (!%p138_p2), 32  }
   0xb   : > { %v718_v0 = vld [vmem:[%s1904_s2] sm:$0xff]  ;;  %v1317_v1 = vmov 0   ;;  %s1907_s13 = smov (!%p161_p3, %s1228_s13), 1  ;;  %vm189_vm0 = vcmask 1043456   ;;  %vm185_vm1 = vcmask 31744   ;;  %vm183_vm2 = vcmask 1039360  }
   0xc   : > { %1307 = vset.pattern.permute.xlu1 %v1317_v1  ;;  %1308 = vset.pattern.permute.xlu0 %v1317_v1  ;;  %s1283_s16 = sshll.u32 %s1907_s13, 3  ;;  %v172_v21 = vld [vmem:[%s1903_s1] sm:$0xff]  ;;  %v1237_v25 = vld [vmem:[%s1903_s1 + $0x8] sm:$0xff]  ;;  %vm357_vm3 = vcmask 916480   ;;  %v1251_v29 = vld [vmem:[%s1903_s1 + $0x18] sm:$0xff]  ;;  %vm295_vm4 = vcmask 1031168  }
   0xd   : > { %721 = vperm.xlu1 %1307, %v718_v0   ;;  %s165_s19 = scalar_lea.vmem %s1902_s0, %s1283_s16  ;;  %v1246_v33 = vld [vmem:[%s1903_s1 + $0x10] sm:$0xff]  ;;  %vm419_vm5 = vcmask 908288   ;;  %v1256_v36 = vld [vmem:[%s1903_s1 + $0x20] sm:$0xff]  ;;  %vm481_vm6 = vcmask 900096   ;;  %v1261_v41 = vld [vmem:[%s1903_s1 + $0x28] sm:$0xff]  ;;  %vm543_vm7 = vcmask 785408  }
   0xe   : > { %v171_v2 = vld [vmem:[%s165_s19] sm:$0xff]  ;;  %v1266_v43 = vld [vmem:[%s1903_s1 + $0x30] sm:$0xff]  ;;  %vm605_vm8 = vcmask 777216   ;;  %v1271_v47 = vld [vmem:[%s1903_s1 + $0x38] sm:$0xff]  ;;  %vm667_vm9 = vcmask 769024   ;;  %vm741_vm10 = vcmask 106496  }
   0xf   : > { %176 = vst [vmem:[#allocation1] ss:$2 sm:$0xff] %v171_v2  ;;  %v1276_v52 = vld [vmem:[%s1903_s1 + $0x40] sm:$0xff]  ;;  %s1330_s30 = smov 16  }
  0x16   : > { %v177_v3 = vld.sshfl [vmem:[#allocation1] sm:$0xff pattern:$0x75316420]  ;;  %v178_v4 = vld.sshfl [vmem:[#allocation1 + $0x8] sm:$0xff pattern:$0x75316420] }
  0x17   : > { %179 = vrot.lane.b32.xlu0 %v177_v3, %s1318_s20  ;;  %234 = vst [vmem:[#allocation1] ss:$2 sm:$0xff] %v171_v2 }
  0x1e   : > { %v235_v5 = vld.sshfl [vmem:[#allocation1] sm:$0xff pattern:$0x75316420]  ;;  %v236_v6 = vld.sshfl [vmem:[#allocation1 + $0x8] sm:$0xff pattern:$0x75316420] }
  0x1f   : > { %288 = vst [vmem:[#allocation1] ss:$2 sm:$0xff] %v171_v2  ;;  %181 = vrot.lane.b32.xlu0 %v178_v4, %s1318_s20  ;;  %1244 = vmatpush.msk.msra.mxu3 %vm189_vm0, %v236_v6 }
  0x20   : > { %1242 = vmatpush.msk.msra.mxu2 %vm189_vm0, %v235_v5  ;;  %1245 = vmatmul.msk.f32.vlgmr.msra.gmra.mxu3 %vm185_vm1, %v172_v21 }
  0x21   : > { %1243 = vmatmul.msk.f32.vlgmr.msra.gmra.mxu2 %vm185_vm1, %v172_v21 }
  0x26   : > { %v289_v7 = vld.sshfl [vmem:[#allocation1] sm:$0xff pattern:$0x75316420]  ;;  %v290_v8 = vld.sshfl [vmem:[#allocation1 + $0x8] sm:$0xff pattern:$0x75316420] }
  0x27   : > { %291 = vrot.lane.b32.xlu1 %v289_v7, %s1319_s21  ;;  %350 = vst [vmem:[#allocation1] ss:$2 sm:$0xff] %v171_v2 }
  0x2e   : > { %v351_v9 = vld.sshfl [vmem:[#allocation1] sm:$0xff pattern:$0x75316420]  ;;  %v352_v10 = vld.sshfl [vmem:[#allocation1 + $0x8] sm:$0xff pattern:$0x75316420] }
  0x2f   : > { %293 = vrot.lane.b32.xlu1 %v290_v8, %s1319_s21  ;;  %412 = vst [vmem:[#allocation1] ss:$2 sm:$0xff] %v171_v2  ;;  %353 = vrot.lane.b32.xlu2 %v351_v9, %s1320_s22  ;;  %s1284_s21 = sshll.u32 %s1907_s13, 7  ;;  %s1326_s13 = smov 80  }
  0x36   : > { %v413_v11 = vld.sshfl [vmem:[#allocation1] sm:$0xff pattern:$0x75316420]  ;;  %v414_v12 = vld.sshfl [vmem:[#allocation1 + $0x8] sm:$0xff pattern:$0x75316420] }
  0x37   : > { %415 = vrot.lane.b32.xlu0 %v413_v11, %s1321_s23  ;;  %417 = vrot.lane.b32.xlu1 %v414_v12, %s1321_s23  ;;  %474 = vst [vmem:[#allocation1] ss:$2 sm:$0xff] %v171_v2 }
  0x38   : > { %355 = vrot.lane.b32.xlu2 %v352_v10, %s1320_s22 }
  0x3e   : > { %v476_v13 = vld.sshfl [vmem:[#allocation1 + $0x8] sm:$0xff pattern:$0x75316420]  ;;  %v475_v14 = vld.sshfl [vmem:[#allocation1] sm:$0xff pattern:$0x75316420] }
  0x3f   : > { %479 = vrot.lane.b32.xlu0 %v476_v13, %s1322_s24  ;;  %536 = vst [vmem:[#allocation1] ss:$2 sm:$0xff] %v171_v2 }
  0x40   : > { %477 = vrot.lane.b32.xlu2 %v475_v14, %s1322_s24 }
  0x46   : > { %v537_v15 = vld.sshfl [vmem:[#allocation1] sm:$0xff pattern:$0x75316420]  ;;  %v538_v16 = vld.sshfl [vmem:[#allocation1 + $0x8] sm:$0xff pattern:$0x75316420] }
  0x47   : > { %539 = vrot.lane.b32.xlu1 %v537_v15, %s1323_s25  ;;  %598 = vst [vmem:[#allocation1] ss:$2 sm:$0xff] %v171_v2 }
  0x48   : > { %541 = vrot.lane.b32.xlu2 %v538_v16, %s1323_s25 }
  0x4e   : > { %v600_v17 = vld.sshfl [vmem:[#allocation1 + $0x8] sm:$0xff pattern:$0x75316420]  ;;  %v599_v18 = vld.sshfl [vmem:[#allocation1] sm:$0xff pattern:$0x75316420] }
  0x4f   : > { %603 = vrot.lane.b32.xlu1 %v600_v17, %s1324_s26  ;;  %601 = vrot.lane.b32.xlu0 %v599_v18, %s1324_s26  ;;  %660 = vst [vmem:[#allocation1] ss:$2 sm:$0xff] %v171_v2  ;;  %s1441_s26 = scalar_lea.vmem %s1905_s3, %s1284_s21 }
  0x56   : > { %v662_v19 = vld.sshfl [vmem:[#allocation1 + $0x8] sm:$0xff pattern:$0x75316420]  ;;  %v661_v20 = vld.sshfl [vmem:[#allocation1] sm:$0xff pattern:$0x75316420] }
  0x57   : > { %665 = vrot.lane.b32.xlu0 %v662_v19, %s1325_s27  ;;  %663 = vrot.lane.b32.xlu2 %v661_v20, %s1325_s27  ;;  %s1327_s27 = smov 48  }
  0x7f   : > { %v1379_v24 = vpop.permute.xlu1 %721 }
  0x89   : > { %v180_v22 = vpop.permute.xlu0 %179  ;;  %v354_v23 = vpop.permute.xlu2 %353 }
  0x91   : > { %v182_v26 = vpop.permute.xlu0 %181 }
  0x92   : > { %v184_v27 = vsel %vm183_vm2, %v180_v22, %v182_v26  ;;  %1240 = vmatpush.msk.msra.mxu1 %vm189_vm0, %v182_v26  ;;  %v356_v28 = vpop.permute.xlu2 %355 }
  0x93   : > { %1238 = vmatpush.msk.msra.mxu0 %vm189_vm0, %v184_v27  ;;  %1241 = vmatmul.msk.f32.vlgmr.msra.gmra.mxu1 %vm185_vm1, %v1237_v25  ;;  %v358_v30 = vsel %vm357_vm3, %v354_v23, %v356_v28 }
  0x94   : > { %1252 = vmatpush.msk.msrb.mxu2 %vm189_vm0, %v358_v30  ;;  %1254 = vmatpush.msk.msrb.mxu3 %vm189_vm0, %v356_v28 }
  0x95   : > { %1239 = vmatmul.msk.f32.vlgmr.msra.gmra.mxu0 %vm185_vm1, %v1237_v25  ;;  %1255 = vmatmul.msk.f32.vlgmr.msrb.gmra.mxu3 %vm185_vm1, %v1251_v29 }
  0x96   : > { %1253 = vmatmul.msk.f32.vlgmr.msrb.gmra.mxu2 %vm185_vm1, %v1251_v29 }
  0x99   : > { %v292_v31 = vpop.permute.xlu1 %291 }
  0x9a   : > { %v478_v32 = vpop.permute.xlu2 %477 }
  0xa1   : > { %v294_v34 = vpop.permute.xlu1 %293 }
  0xa2   : > { %v296_v35 = vsel %vm295_vm4, %v292_v31, %v294_v34  ;;  %1249 = vmatpush.msk.msrb.mxu1 %vm189_vm0, %v294_v34  ;;  %v542_v37 = vpop.permute.xlu2 %541 }
  0xa3   : > { %1247 = vmatpush.msk.msrb.mxu0 %vm189_vm0, %v296_v35  ;;  %1250 = vmatmul.msk.f32.vlgmr.msrb.gmra.mxu1 %vm185_vm1, %v1246_v33  ;;  %v281_v59 = vpop.f32.mrf.mxu3 }
  0xa4   : > { %1248 = vmatmul.msk.f32.vlgmr.msrb.gmra.mxu0 %vm185_vm1, %v1246_v33  ;;  %v261_v57 = vpop.f32.mrf.mxu2 }
  0xa9   : > { %v416_v38 = vpop.permute.xlu0 %415  ;;  %v418_v39 = vpop.permute.xlu1 %417 }
  0xaa   : > { %v420_v40 = vsel %vm419_vm5, %v416_v38, %v418_v39  ;;  %1259 = vmatpush.msk.msra.mxu1 %vm189_vm0, %v418_v39 }
  0xab   : > { %1257 = vmatpush.msk.msra.mxu0 %vm189_vm0, %v420_v40  ;;  %1260 = vmatmul.msk.f32.vlgmr.msra.gmra.mxu1 %vm185_vm1, %v1256_v36 }
  0xac   : > { %1269 = vmatpush.msk.msrb.mxu1 %vm189_vm0, %v542_v37  ;;  %1258 = vmatmul.msk.f32.vlgmr.msra.gmra.mxu0 %vm185_vm1, %v1256_v36 }
  0xb1   : > { %v480_v42 = vpop.permute.xlu0 %479  ;;  %v664_v51 = vpop.permute.xlu2 %663 }
  0xb2   : > { %v482_v44 = vsel %vm481_vm6, %v478_v32, %v480_v42  ;;  %1264 = vmatpush.msk.msra.mxu3 %vm189_vm0, %v480_v42 }
  0xb3   : > { %1265 = vmatmul.msk.f32.vlgmr.msra.gmra.mxu3 %vm185_vm1, %v1261_v41  ;;  %1262 = vmatpush.msk.msra.mxu2 %vm189_vm0, %v482_v44 }
  0xb4   : > { %1263 = vmatmul.msk.f32.vlgmr.msra.gmra.mxu2 %vm185_vm1, %v1261_v41  ;;  %1270 = vmatmul.msk.f32.vlgmr.msrb.gmra.mxu1 %vm185_vm1, %v1266_v43 }
  0xb9   : > { %v540_v45 = vpop.permute.xlu1 %539 }
  0xba   : > { %v544_v46 = vsel %vm543_vm7, %v540_v45, %v542_v37 }
  0xbb   : > { %1267 = vmatpush.msk.msrb.mxu0 %vm189_vm0, %v544_v46 }
  0xbc   : > { %1268 = vmatmul.msk.f32.vlgmr.msrb.gmra.mxu0 %vm185_vm1, %v1266_v43 }
  0xc1   : > { %v604_v48 = vpop.permute.xlu1 %603  ;;  %v602_v49 = vpop.permute.xlu0 %601 }
  0xc2   : > { %v606_v50 = vsel %vm605_vm8, %v602_v49, %v604_v48  ;;  %1274 = vmatpush.msk.msrb.mxu3 %vm189_vm0, %v604_v48 }
  0xc3   : > { %1272 = vmatpush.msk.msrb.mxu2 %vm189_vm0, %v606_v50  ;;  %1275 = vmatmul.msk.f32.vlgmr.msrb.gmra.mxu3 %vm185_vm1, %v1271_v47 }
  0xc4   : > { %1273 = vmatmul.msk.f32.vlgmr.msrb.gmra.mxu2 %vm185_vm1, %v1271_v47 }
  0xc9   : > { %v666_v53 = vpop.permute.xlu0 %665 }
  0xca   : > { %v668_v54 = vsel %vm667_vm9, %v664_v51, %v666_v53  ;;  %1279 = vmatpush.msk.msra.mxu1 %vm189_vm0, %v666_v53 }
  0xcb   : > { %1277 = vmatpush.msk.msra.mxu0 %vm189_vm0, %v668_v54  ;;  %1280 = vmatmul.msk.f32.vlgmr.msra.gmra.mxu1 %vm185_vm1, %v1276_v52 }
  0xcc   : > { %1278 = vmatmul.msk.f32.vlgmr.msra.gmra.mxu0 %vm185_vm1, %v1276_v52 }
 0x110   : > { %v231_v56 = vpop.f32.mrf.mxu1 }
 0x111   : > { %v282_v62 = vadd.f32 %v281_v59, %v231_v56 }
 0x112   : > { %v211_v55 = vpop.f32.mrf.mxu0 }
 0x113   : > { %v262_v61 = vadd.f32 %v261_v57, %v211_v55 }
 0x118   : > { %v403_v1 = vpop.f32.mrf.mxu3 }
 0x119   : > { %v383_v63 = vpop.f32.mrf.mxu2 }
 0x120   : > { %v341_v60 = vpop.f32.mrf.mxu1 }
 0x121   : > { %v321_v58 = vpop.f32.mrf.mxu0  ;;  %v345_v3 = vadd.f32 %v341_v60, %v282_v62 }
 0x122   : > { %v344_v2 = vadd.f32 %v321_v58, %v262_v61 }
 0x123   : > { %v407_v6 = vadd.f32 %v403_v1, %v345_v3 }
 0x124   : > { %v406_v5 = vadd.f32 %v383_v63, %v344_v2 }
 0x128   : > { %v465_v4 = vpop.f32.mrf.mxu1 }
 0x129   : > { %v445_v0 = vpop.f32.mrf.mxu0  ;;  %v469_v10 = vadd.f32 %v465_v4, %v407_v6 }
 0x12a   : > { %v468_v9 = vadd.f32 %v445_v0, %v406_v5 }
 0x131   : > { %v589_v12 = vpop.f32.mrf.mxu1 }
 0x136   : > { %v527_v8 = vpop.f32.mrf.mxu3 }
 0x137   : > { %v507_v7 = vpop.f32.mrf.mxu2  ;;  %v531_v13 = vadd.f32 %v527_v8, %v469_v10 }
 0x138   : > { %v530_v14 = vadd.f32 %v507_v7, %v468_v9 }
 0x139   : > { %v569_v11 = vpop.f32.mrf.mxu0  ;;  %v593_v15 = vadd.f32 %v589_v12, %v531_v13 }
 0x13a   : > { %v592_v16 = vadd.f32 %v569_v11, %v530_v14 }
 0x146   : > { %v651_v17 = vpop.f32.mrf.mxu3 }
 0x147   : > { %v655_v18 = vadd.f32 %v651_v17, %v593_v15  ;;  %v631_v19 = vpop.f32.mrf.mxu2 }
 0x148   : > { %v654_v20 = vadd.f32 %v631_v19, %v592_v16  ;;  %v713_v21 = vpop.f32.mrf.mxu1 }
 0x149   : > { %v717_v22 = vadd.f32 %v713_v21, %v655_v18  ;;  %v693_v23 = vpop.f32.mrf.mxu0 }
 0x14a   : > { %v716_v25 = vadd.f32 %v693_v23, %v654_v20 }
 0x14b   : > { %v1444_v26 = vadd.f32 %v1379_v24, %v717_v22 }
 0x14c   : > { %v1447_v27 = vadd.f32 %v1379_v24, %v716_v25 }
 0x14d   : > { %997 = vst.msk [vmem:[%s1441_s26 + $0x8] sm:$0x1] %vm741_vm10, %v1444_v26  ;;  %v1005_v28 = vperm.slane %v1444_v26, 0  ;;  %v984_v29 = vrot.slane %v1444_v26, 2  ;;  %v985_v30 = vrot.slane %v1444_v26, 3  ;;  %v983_v31 = vrot.slane %v1444_v26, 1 }
 0x14e   : > { %742 = vst.msk [vmem:[%s1441_s26] sm:$0x1] %vm741_vm10, %v1447_v27  ;;  %v987_v24 = vrot.slane %v1444_v26, 5  ;;  %v988_v32 = vrot.slane %v1444_v26, 6  ;;  %v986_v33 = vrot.slane %v1444_v26, 4  ;;  %v989_v34 = vrot.slane %v1444_v26, 7 }
 0x14f   : > { %1045 = vrot.lane.b32.xlu0 %v1005_v28, %s1323_s25  ;;  %1013 = vrot.lane.b32.xlu1 %v1005_v28, %s1320_s22  ;;  %999 = vst.msk [vmem:[%s1441_s26 + $0x28] sm:$0x1] %vm741_vm10, %v984_v29  ;;  %v727_v35 = vrot.slane %v1447_v27, 1  ;;  %v729_v36 = vrot.slane %v1447_v27, 3  ;;  %v728_v37 = vrot.slane %v1447_v27, 2  ;;  %v730_v38 = vrot.slane %v1447_v27, 4 }
 0x150   : > { %1077 = vrot.lane.b32.xlu2 %v1005_v28, %s1326_s13  ;;  %1000 = vst.msk [vmem:[%s1441_s26 + $0x38] sm:$0x1] %vm741_vm10, %v985_v30  ;;  %v750_v39 = vperm.slane %v1447_v27, 0  ;;  %v732_v40 = vrot.slane %v1447_v27, 6  ;;  %v731_v41 = vrot.slane %v1447_v27, 5  ;;  %v733_v42 = vrot.slane %v1447_v27, 7 }
 0x151   : > { %998 = vst.msk [vmem:[%s1441_s26 + $0x18] sm:$0x1] %vm741_vm10, %v983_v31  ;;  %v1007_v43 = vperm.slane %v984_v29, 0  ;;  %v1008_v44 = vperm.slane %v985_v30, 0  ;;  %v1006_v45 = vperm.slane %v983_v31, 0  ;;  %v1528_v46 = vperm.slane %v987_v24, 0 }
 0x152   : > { %1002 = vst.msk [vmem:[%s1441_s26 + $0x58] sm:$0x1] %vm741_vm10, %v987_v24  ;;  %v1530_v47 = vperm.slane %v988_v32, 0  ;;  %v1009_v48 = vperm.slane %v986_v33, 0  ;;  %v1537_v49 = vperm.slane %v989_v34, 0  ;;  %v1581_v53 = vperm.slane %v727_v35, 0 }
 0x153   : > { %1003 = vst.msk [vmem:[%s1441_s26 + $0x68] sm:$0x1] %vm741_vm10, %v988_v32  ;;  %v1595_v57 = vperm.slane %v728_v37, 0  ;;  %v1599_v58 = vperm.slane %v730_v38, 0  ;;  %v1603_v59 = vperm.slane %v729_v36, 0  ;;  %v1619_v63 = vperm.slane %v731_v41, 0 }
 0x154   : > { %1001 = vst.msk [vmem:[%s1441_s26 + $0x48] sm:$0x1] %vm741_vm10, %v986_v33  ;;  %v1623_v0 = vperm.slane %v733_v42, 0  ;;  %v1627_v1 = vperm.slane %v732_v40, 0 }
 0x155   : > { %1004 = vst.msk [vmem:[%s1441_s26 + $0x78] sm:$0x1] %vm741_vm10, %v989_v34 }
 0x156   : > { %743 = vst.msk [vmem:[%s1441_s26 + $0x10] sm:$0x1] %vm741_vm10, %v727_v35 }
 0x157   : > { %1141 = vrot.lane.b32.xlu0 %v1005_v28, %s1327_s27  ;;  %1109 = vrot.lane.b32.xlu1 %v1005_v28, %s1328_s28  ;;  %745 = vst.msk [vmem:[%s1441_s26 + $0x30] sm:$0x1] %vm741_vm10, %v729_v36 }
 0x158   : > { %758 = vrot.lane.b32.xlu2 %v750_v39, %s1320_s22  ;;  %744 = vst.msk [vmem:[%s1441_s26 + $0x20] sm:$0x1] %vm741_vm10, %v728_v37 }
 0x159   : > { %746 = vst.msk [vmem:[%s1441_s26 + $0x40] sm:$0x1] %vm741_vm10, %v730_v38 }
 0x15a   : > { %748 = vst.msk [vmem:[%s1441_s26 + $0x60] sm:$0x1] %vm741_vm10, %v732_v40 }
 0x15b   : > { %747 = vst.msk [vmem:[%s1441_s26 + $0x50] sm:$0x1] %vm741_vm10, %v731_v41 }
 0x15c   : > { %749 = vst.msk [vmem:[%s1441_s26 + $0x70] sm:$0x1] %vm741_vm10, %v733_v42 }
 0x15f   : > { %822 = vrot.lane.b32.xlu0 %v750_v39, %s1326_s13  ;;  %790 = vrot.lane.b32.xlu1 %v750_v39, %s1323_s25 }
 0x160   : > { %854 = vrot.lane.b32.xlu2 %v750_v39, %s1328_s28 }
 0x167   : > { %918 = vrot.lane.b32.xlu0 %v750_v39, %s1329_s29  ;;  %886 = vrot.lane.b32.xlu1 %v750_v39, %s1327_s27 }
 0x168   : > { %950 = vrot.lane.b32.xlu2 %v750_v39, %s1330_s30 }
 0x16f   : > { %1017 = vrot.lane.b32.xlu0 %v1007_v43, %s1320_s22  ;;  %1019 = vrot.lane.b32.xlu1 %v1008_v44, %s1320_s22 }
 0x170   : > { %1015 = vrot.lane.b32.xlu2 %v1006_v45, %s1320_s22 }
 0x177   : > { %1023 = vrot.lane.b32.xlu0 %v1528_v46, %s1320_s22  ;;  %1025 = vrot.lane.b32.xlu1 %v1530_v47, %s1320_s22 }
 0x178   : > { %1021 = vrot.lane.b32.xlu2 %v1009_v48, %s1320_s22 }
 0x17f   : > { %1051 = vrot.lane.b32.xlu0 %v1008_v44, %s1323_s25  ;;  %1047 = vrot.lane.b32.xlu1 %v1006_v45, %s1323_s25 }
 0x180   : > { %1027 = vrot.lane.b32.xlu2 %v1537_v49, %s1320_s22 }
 0x187   : > { %1057 = vrot.lane.b32.xlu0 %v1530_v47, %s1323_s25  ;;  %1053 = vrot.lane.b32.xlu1 %v1009_v48, %s1323_s25 }
 0x188   : > { %1049 = vrot.lane.b32.xlu2 %v1007_v43, %s1323_s25 }
 0x18f   : > { %1079 = vrot.lane.b32.xlu0 %v1006_v45, %s1326_s13  ;;  %1059 = vrot.lane.b32.xlu1 %v1537_v49, %s1323_s25 }
 0x190   : > { %1055 = vrot.lane.b32.xlu2 %v1528_v46, %s1323_s25 }
 0x197   : > { %1085 = vrot.lane.b32.xlu0 %v1009_v48, %s1326_s13  ;;  %1081 = vrot.lane.b32.xlu1 %v1007_v43, %s1326_s13 }
 0x198   : > { %1083 = vrot.lane.b32.xlu2 %v1008_v44, %s1326_s13 }
 0x19f   : > { %1091 = vrot.lane.b32.xlu0 %v1537_v49, %s1326_s13  ;;  %1087 = vrot.lane.b32.xlu1 %v1528_v46, %s1326_s13 }
 0x1a0   : > { %1089 = vrot.lane.b32.xlu2 %v1530_v47, %s1326_s13 }
 0x1a7   : > { %1113 = vrot.lane.b32.xlu0 %v1007_v43, %s1328_s28  ;;  %1115 = vrot.lane.b32.xlu1 %v1008_v44, %s1328_s28 }
 0x1a8   : > { %1111 = vrot.lane.b32.xlu2 %v1006_v45, %s1328_s28 }
 0x1aa   : > { %v1078_v50 = vpop.permute.xlu2 %1077 }
 0x1ab   : > { %1101 = vst.msk [vmem:[%s1441_s26 + $0xb] sm:$0x1] %vm741_vm10, %v1078_v50 }
 0x1af   : > { %1119 = vrot.lane.b32.xlu0 %v1528_v46, %s1328_s28  ;;  %1121 = vrot.lane.b32.xlu1 %v1530_v47, %s1328_s28 }
 0x1b0   : > { %1117 = vrot.lane.b32.xlu2 %v1009_v48, %s1328_s28 }
 0x1b2   : > { %v759_v51 = vpop.permute.xlu2 %758 }
 0x1b3   : > { %782 = vst.msk [vmem:[%s1441_s26 + $0x1] sm:$0x1] %vm741_vm10, %v759_v51 }
 0x1b7   : > { %1147 = vrot.lane.b32.xlu0 %v1008_v44, %s1327_s27  ;;  %1143 = vrot.lane.b32.xlu1 %v1006_v45, %s1327_s27 }
 0x1b8   : > { %1123 = vrot.lane.b32.xlu2 %v1537_v49, %s1328_s28 }
 0x1ba   : > { %v855_v52 = vpop.permute.xlu2 %854 }
 0x1bb   : > { %878 = vst.msk [vmem:[%s1441_s26 + $0x4] sm:$0x1] %vm741_vm10, %v855_v52 }
 0x1bf   : > { %1149 = vrot.lane.b32.xlu1 %v1009_v48, %s1327_s27  ;;  %760 = vrot.lane.b32.xlu0 %v1581_v53, %s1320_s22 }
 0x1c0   : > { %1145 = vrot.lane.b32.xlu2 %v1007_v43, %s1327_s27 }
 0x1c1   : > { %v1046_v54 = vpop.permute.xlu0 %1045  ;;  %v1014_v55 = vpop.permute.xlu1 %1013 }
 0x1c2   : > { %1069 = vst.msk [vmem:[%s1441_s26 + $0xa] sm:$0x1] %vm741_vm10, %v1046_v54  ;;  %v951_v56 = vpop.permute.xlu2 %950 }
 0x1c3   : > { %1037 = vst.msk [vmem:[%s1441_s26 + $0x9] sm:$0x1] %vm741_vm10, %v1014_v55 }
 0x1c4   : > { %974 = vst.msk [vmem:[%s1441_s26 + $0x7] sm:$0x1] %vm741_vm10, %v951_v56 }
 0x1c7   : > { %762 = vrot.lane.b32.xlu1 %v1595_v57, %s1320_s22  ;;  %766 = vrot.lane.b32.xlu0 %v1599_v58, %s1320_s22 }
 0x1c8   : > { %764 = vrot.lane.b32.xlu2 %v1603_v59, %s1320_s22 }
 0x1c9   : > { %v1142_v60 = vpop.permute.xlu0 %1141  ;;  %v1110_v61 = vpop.permute.xlu1 %1109 }
 0x1ca   : > { %1165 = vst.msk [vmem:[%s1441_s26 + $0xd] sm:$0x1] %vm741_vm10, %v1142_v60  ;;  %v1016_v62 = vpop.permute.xlu2 %1015 }
 0x1cb   : > { %1133 = vst.msk [vmem:[%s1441_s26 + $0xc] sm:$0x1] %vm741_vm10, %v1110_v61 }
 0x1cc   : > { %1038 = vst.msk [vmem:[%s1441_s26 + $0x19] sm:$0x1] %vm741_vm10, %v1016_v62 }
 0x1cf   : > { %768 = vrot.lane.b32.xlu1 %v1619_v63, %s1320_s22  ;;  %772 = vrot.lane.b32.xlu0 %v1623_v0, %s1320_s22 }
 0x1d0   : > { %770 = vrot.lane.b32.xlu2 %v1627_v1, %s1320_s22 }
 0x1d1   : > { %v823_v2 = vpop.permute.xlu0 %822  ;;  %v791_v3 = vpop.permute.xlu1 %790 }
 0x1d2   : > { %846 = vst.msk [vmem:[%s1441_s26 + $0x3] sm:$0x1] %vm741_vm10, %v823_v2  ;;  %v1022_v4 = vpop.permute.xlu2 %1021 }
 0x1d3   : > { %814 = vst.msk [vmem:[%s1441_s26 + $0x2] sm:$0x1] %vm741_vm10, %v791_v3 }
 0x1d4   : > { %1041 = vst.msk [vmem:[%s1441_s26 + $0x49] sm:$0x1] %vm741_vm10, %v1022_v4 }
 0x1d7   : > { %796 = vrot.lane.b32.xlu1 %v1603_v59, %s1323_s25  ;;  %794 = vrot.lane.b32.xlu0 %v1595_v57, %s1323_s25 }
 0x1d8   : > { %792 = vrot.lane.b32.xlu2 %v1581_v53, %s1323_s25 }
 0x1d9   : > { %v919_v5 = vpop.permute.xlu0 %918  ;;  %v887_v6 = vpop.permute.xlu1 %886 }
 0x1da   : > { %942 = vst.msk [vmem:[%s1441_s26 + $0x6] sm:$0x1] %vm741_vm10, %v919_v5  ;;  %v1028_v7 = vpop.permute.xlu2 %1027 }
 0x1db   : > { %910 = vst.msk [vmem:[%s1441_s26 + $0x5] sm:$0x1] %vm741_vm10, %v887_v6 }
 0x1dc   : > { %1044 = vst.msk [vmem:[%s1441_s26 + $0x79] sm:$0x1] %vm741_vm10, %v1028_v7 }
 0x1df   : > { %802 = vrot.lane.b32.xlu1 %v1627_v1, %s1323_s25  ;;  %800 = vrot.lane.b32.xlu0 %v1619_v63, %s1323_s25 }
 0x1e0   : > { %798 = vrot.lane.b32.xlu2 %v1599_v58, %s1323_s25 }
 0x1e1   : > { %v1018_v8 = vpop.permute.xlu0 %1017  ;;  %v1020_v9 = vpop.permute.xlu1 %1019 }
 0x1e2   : > { %1039 = vst.msk [vmem:[%s1441_s26 + $0x29] sm:$0x1] %vm741_vm10, %v1018_v8  ;;  %v1050_v10 = vpop.permute.xlu2 %1049 }
 0x1e3   : > { %1040 = vst.msk [vmem:[%s1441_s26 + $0x39] sm:$0x1] %vm741_vm10, %v1020_v9 }
 0x1e4   : > { %1071 = vst.msk [vmem:[%s1441_s26 + $0x2a] sm:$0x1] %vm741_vm10, %v1050_v10 }
 0x1e7   : > { %824 = vrot.lane.b32.xlu1 %v1581_v53, %s1326_s13  ;;  %828 = vrot.lane.b32.xlu0 %v1603_v59, %s1326_s13 }
 0x1e8   : > { %804 = vrot.lane.b32.xlu2 %v1623_v0, %s1323_s25 }
 0x1e9   : > { %v1024_v11 = vpop.permute.xlu0 %1023  ;;  %v1026_v12 = vpop.permute.xlu1 %1025 }
 0x1ea   : > { %1042 = vst.msk [vmem:[%s1441_s26 + $0x59] sm:$0x1] %vm741_vm10, %v1024_v11  ;;  %v1056_v13 = vpop.permute.xlu2 %1055 }
 0x1eb   : > { %1043 = vst.msk [vmem:[%s1441_s26 + $0x69] sm:$0x1] %vm741_vm10, %v1026_v12 }
 0x1ec   : > { %1074 = vst.msk [vmem:[%s1441_s26 + $0x5a] sm:$0x1] %vm741_vm10, %v1056_v13 }
 0x1ef   : > { %830 = vrot.lane.b32.xlu1 %v1599_v58, %s1326_s13  ;;  %834 = vrot.lane.b32.xlu0 %v1627_v1, %s1326_s13 }
 0x1f0   : > { %826 = vrot.lane.b32.xlu2 %v1595_v57, %s1326_s13 }
 0x1f1   : > { %v1052_v14 = vpop.permute.xlu0 %1051  ;;  %v1048_v15 = vpop.permute.xlu1 %1047 }
 0x1f2   : > { %1072 = vst.msk [vmem:[%s1441_s26 + $0x3a] sm:$0x1] %vm741_vm10, %v1052_v14  ;;  %v1084_v16 = vpop.permute.xlu2 %1083 }
 0x1f3   : > { %1070 = vst.msk [vmem:[%s1441_s26 + $0x1a] sm:$0x1] %vm741_vm10, %v1048_v15 }
 0x1f4   : > { %1104 = vst.msk [vmem:[%s1441_s26 + $0x3b] sm:$0x1] %vm741_vm10, %v1084_v16 }
 0x1f7   : > { %836 = vrot.lane.b32.xlu1 %v1623_v0, %s1326_s13  ;;  %856 = vrot.lane.b32.xlu0 %v1581_v53, %s1328_s28 }
 0x1f8   : > { %832 = vrot.lane.b32.xlu2 %v1619_v63, %s1326_s13 }
 0x1f9   : > { %v1058_v17 = vpop.permute.xlu0 %1057  ;;  %v1054_v18 = vpop.permute.xlu1 %1053 }
 0x1fa   : > { %1075 = vst.msk [vmem:[%s1441_s26 + $0x6a] sm:$0x1] %vm741_vm10, %v1058_v17  ;;  %v1090_v19 = vpop.permute.xlu2 %1089 }
 0x1fb   : > { %1073 = vst.msk [vmem:[%s1441_s26 + $0x4a] sm:$0x1] %vm741_vm10, %v1054_v18 }
 0x1fc   : > { %1107 = vst.msk [vmem:[%s1441_s26 + $0x6b] sm:$0x1] %vm741_vm10, %v1090_v19 }
 0x1ff   : > { %858 = vrot.lane.b32.xlu1 %v1595_v57, %s1328_s28  ;;  %862 = vrot.lane.b32.xlu0 %v1599_v58, %s1328_s28 }
 0x200   : > { %860 = vrot.lane.b32.xlu2 %v1603_v59, %s1328_s28 }
 0x201   : > { %v1080_v20 = vpop.permute.xlu0 %1079  ;;  %v1060_v21 = vpop.permute.xlu1 %1059 }
 0x202   : > { %1102 = vst.msk [vmem:[%s1441_s26 + $0x1b] sm:$0x1] %vm741_vm10, %v1080_v20  ;;  %v1112_v22 = vpop.permute.xlu2 %1111 }
 0x203   : > { %1076 = vst.msk [vmem:[%s1441_s26 + $0x7a] sm:$0x1] %vm741_vm10, %v1060_v21 }
 0x204   : > { %1134 = vst.msk [vmem:[%s1441_s26 + $0x1c] sm:$0x1] %vm741_vm10, %v1112_v22 }
 0x207   : > { %864 = vrot.lane.b32.xlu1 %v1619_v63, %s1328_s28  ;;  %868 = vrot.lane.b32.xlu0 %v1623_v0, %s1328_s28 }
 0x208   : > { %866 = vrot.lane.b32.xlu2 %v1627_v1, %s1328_s28 }
 0x209   : > { %v1086_v23 = vpop.permute.xlu0 %1085  ;;  %v1082_v25 = vpop.permute.xlu1 %1081 }
 0x20a   : > { %1105 = vst.msk [vmem:[%s1441_s26 + $0x4b] sm:$0x1] %vm741_vm10, %v1086_v23  ;;  %v1118_v26 = vpop.permute.xlu2 %1117 }
 0x20b   : > { %1103 = vst.msk [vmem:[%s1441_s26 + $0x2b] sm:$0x1] %vm741_vm10, %v1082_v25 }
 0x20c   : > { %1137 = vst.msk [vmem:[%s1441_s26 + $0x4c] sm:$0x1] %vm741_vm10, %v1118_v26 }
 0x20f   : > { %892 = vrot.lane.b32.xlu1 %v1603_v59, %s1327_s27  ;;  %890 = vrot.lane.b32.xlu0 %v1595_v57, %s1327_s27 }
 0x210   : > { %888 = vrot.lane.b32.xlu2 %v1581_v53, %s1327_s27 }
 0x211   : > { %v1092_v27 = vpop.permute.xlu0 %1091  ;;  %v1088_v28 = vpop.permute.xlu1 %1087 }
 0x212   : > { %1108 = vst.msk [vmem:[%s1441_s26 + $0x7b] sm:$0x1] %vm741_vm10, %v1092_v27  ;;  %v1124_v29 = vpop.permute.xlu2 %1123 }
 0x213   : > { %1106 = vst.msk [vmem:[%s1441_s26 + $0x5b] sm:$0x1] %vm741_vm10, %v1088_v28 }
 0x214   : > { %1140 = vst.msk [vmem:[%s1441_s26 + $0x7c] sm:$0x1] %vm741_vm10, %v1124_v29 }
 0x217   : > { %898 = vrot.lane.b32.xlu1 %v1627_v1, %s1327_s27  ;;  %896 = vrot.lane.b32.xlu0 %v1619_v63, %s1327_s27 }
 0x218   : > { %894 = vrot.lane.b32.xlu2 %v1599_v58, %s1327_s27 }
 0x219   : > { %v1114_v30 = vpop.permute.xlu0 %1113  ;;  %v1116_v31 = vpop.permute.xlu1 %1115 }
 0x21a   : > { %1135 = vst.msk [vmem:[%s1441_s26 + $0x2c] sm:$0x1] %vm741_vm10, %v1114_v30  ;;  %v1146_v24 = vpop.permute.xlu2 %1145 }
 0x21b   : > { %1136 = vst.msk [vmem:[%s1441_s26 + $0x3c] sm:$0x1] %vm741_vm10, %v1116_v31 }
 0x21c   : > { %1167 = vst.msk [vmem:[%s1441_s26 + $0x2d] sm:$0x1] %vm741_vm10, %v1146_v24 }
 0x21f   : > { %920 = vrot.lane.b32.xlu1 %v1581_v53, %s1329_s29  ;;  %924 = vrot.lane.b32.xlu0 %v1603_v59, %s1329_s29 }
 0x220   : > { %900 = vrot.lane.b32.xlu2 %v1623_v0, %s1327_s27 }
 0x221   : > { %v1120_v32 = vpop.permute.xlu0 %1119  ;;  %v1122_v33 = vpop.permute.xlu1 %1121 }
 0x222   : > { %1138 = vst.msk [vmem:[%s1441_s26 + $0x5c] sm:$0x1] %vm741_vm10, %v1120_v32  ;;  %v765_v34 = vpop.permute.xlu2 %764 }
 0x223   : > { %1139 = vst.msk [vmem:[%s1441_s26 + $0x6c] sm:$0x1] %vm741_vm10, %v1122_v33 }
 0x224   : > { %785 = vst.msk [vmem:[%s1441_s26 + $0x31] sm:$0x1] %vm741_vm10, %v765_v34 }
 0x227   : > { %926 = vrot.lane.b32.xlu1 %v1599_v58, %s1329_s29  ;;  %930 = vrot.lane.b32.xlu0 %v1627_v1, %s1329_s29 }
 0x228   : > { %922 = vrot.lane.b32.xlu2 %v1595_v57, %s1329_s29 }
 0x229   : > { %v1148_v35 = vpop.permute.xlu0 %1147  ;;  %v1144_v36 = vpop.permute.xlu1 %1143 }
 0x22a   : > { %1168 = vst.msk [vmem:[%s1441_s26 + $0x3d] sm:$0x1] %vm741_vm10, %v1148_v35  ;;  %v771_v37 = vpop.permute.xlu2 %770 }
 0x22b   : > { %1166 = vst.msk [vmem:[%s1441_s26 + $0x1d] sm:$0x1] %vm741_vm10, %v1144_v36 }
 0x22c   : > { %788 = vst.msk [vmem:[%s1441_s26 + $0x61] sm:$0x1] %vm741_vm10, %v771_v37 }
 0x22f   : > { %932 = vrot.lane.b32.xlu1 %v1623_v0, %s1329_s29  ;;  %952 = vrot.lane.b32.xlu0 %v1581_v53, %s1330_s30 }
 0x230   : > { %928 = vrot.lane.b32.xlu2 %v1619_v63, %s1329_s29 }
 0x231   : > { %v1150_v38 = vpop.permute.xlu1 %1149  ;;  %v761_v39 = vpop.permute.xlu0 %760 }
 0x232   : > { %1169 = vst.msk [vmem:[%s1441_s26 + $0x4d] sm:$0x1] %vm741_vm10, %v1150_v38  ;;  %v793_v40 = vpop.permute.xlu2 %792 }
 0x233   : > { %815 = vst.msk [vmem:[%s1441_s26 + $0x12] sm:$0x1] %vm741_vm10, %v793_v40 }
 0x234   : > { %783 = vst.msk [vmem:[%s1441_s26 + $0x11] sm:$0x1] %vm741_vm10, %v761_v39 }
 0x237   : > { %954 = vrot.lane.b32.xlu1 %v1595_v57, %s1330_s30  ;;  %958 = vrot.lane.b32.xlu0 %v1599_v58, %s1330_s30 }
 0x238   : > { %956 = vrot.lane.b32.xlu2 %v1603_v59, %s1330_s30 }
 0x239   : > { %v763_v41 = vpop.permute.xlu1 %762  ;;  %v767_v42 = vpop.permute.xlu0 %766 }
 0x23a   : > { %784 = vst.msk [vmem:[%s1441_s26 + $0x21] sm:$0x1] %vm741_vm10, %v763_v41  ;;  %v799_v43 = vpop.permute.xlu2 %798 }
 0x23b   : > { %818 = vst.msk [vmem:[%s1441_s26 + $0x42] sm:$0x1] %vm741_vm10, %v799_v43 }
 0x23c   : > { %786 = vst.msk [vmem:[%s1441_s26 + $0x41] sm:$0x1] %vm741_vm10, %v767_v42 }
 0x23f   : > { %960 = vrot.lane.b32.xlu1 %v1619_v63, %s1330_s30  ;;  %964 = vrot.lane.b32.xlu0 %v1623_v0, %s1330_s30 }
 0x240   : > { %962 = vrot.lane.b32.xlu2 %v1627_v1, %s1330_s30 }
 0x241   : > { %v769_v44 = vpop.permute.xlu1 %768  ;;  %v773_v45 = vpop.permute.xlu0 %772 }
 0x242   : > { %787 = vst.msk [vmem:[%s1441_s26 + $0x51] sm:$0x1] %vm741_vm10, %v769_v44  ;;  %v805_v48 = vpop.permute.xlu2 %804 }
 0x243   : > { %821 = vst.msk [vmem:[%s1441_s26 + $0x72] sm:$0x1] %vm741_vm10, %v805_v48 }
 0x244   : > { %789 = vst.msk [vmem:[%s1441_s26 + $0x71] sm:$0x1] %vm741_vm10, %v773_v45 }
 0x247   : > { %1155 = vrot.lane.b32.xlu1 %v1537_v49, %s1327_s27  ;;  %1153 = vrot.lane.b32.xlu0 %v1530_v47, %s1327_s27 }
 0x248   : > { %1151 = vrot.lane.b32.xlu2 %v1528_v46, %s1327_s27 }
 0x249   : > { %v797_v50 = vpop.permute.xlu1 %796  ;;  %v795_v51 = vpop.permute.xlu0 %794 }
 0x24a   : > { %817 = vst.msk [vmem:[%s1441_s26 + $0x32] sm:$0x1] %vm741_vm10, %v797_v50  ;;  %v827_v52 = vpop.permute.xlu2 %826 }
 0x24b   : > { %848 = vst.msk [vmem:[%s1441_s26 + $0x23] sm:$0x1] %vm741_vm10, %v827_v52 }
 0x24c   : > { %816 = vst.msk [vmem:[%s1441_s26 + $0x22] sm:$0x1] %vm741_vm10, %v795_v51 }
 0x251   : > { %v803_v49 = vpop.permute.xlu1 %802  ;;  %v801_v53 = vpop.permute.xlu0 %800 }
 0x252   : > { %820 = vst.msk [vmem:[%s1441_s26 + $0x62] sm:$0x1] %vm741_vm10, %v803_v49  ;;  %v833_v47 = vpop.permute.xlu2 %832 }
 0x253   : > { %851 = vst.msk [vmem:[%s1441_s26 + $0x53] sm:$0x1] %vm741_vm10, %v833_v47 }
 0x254   : > { %819 = vst.msk [vmem:[%s1441_s26 + $0x52] sm:$0x1] %vm741_vm10, %v801_v53 }
 0x259   : > { %v825_v46 = vpop.permute.xlu1 %824  ;;  %v829_v54 = vpop.permute.xlu0 %828 }
 0x25a   : > { %847 = vst.msk [vmem:[%s1441_s26 + $0x13] sm:$0x1] %vm741_vm10, %v825_v46  ;;  %v861_v55 = vpop.permute.xlu2 %860 }
 0x25b   : > { %881 = vst.msk [vmem:[%s1441_s26 + $0x34] sm:$0x1] %vm741_vm10, %v861_v55 }
 0x25c   : > { %849 = vst.msk [vmem:[%s1441_s26 + $0x33] sm:$0x1] %vm741_vm10, %v829_v54 }
 0x261   : > { %v831_v56 = vpop.permute.xlu1 %830  ;;  %v835_v57 = vpop.permute.xlu0 %834 }
 0x262   : > { %850 = vst.msk [vmem:[%s1441_s26 + $0x43] sm:$0x1] %vm741_vm10, %v831_v56  ;;  %v867_v58 = vpop.permute.xlu2 %866 }
 0x263   : > { %884 = vst.msk [vmem:[%s1441_s26 + $0x64] sm:$0x1] %vm741_vm10, %v867_v58 }
 0x264   : > { %852 = vst.msk [vmem:[%s1441_s26 + $0x63] sm:$0x1] %vm741_vm10, %v835_v57 }
 0x269   : > { %v837_v59 = vpop.permute.xlu1 %836  ;;  %v857_v60 = vpop.permute.xlu0 %856 }
 0x26a   : > { %853 = vst.msk [vmem:[%s1441_s26 + $0x73] sm:$0x1] %vm741_vm10, %v837_v59  ;;  %v889_v61 = vpop.permute.xlu2 %888 }
 0x26b   : > { %911 = vst.msk [vmem:[%s1441_s26 + $0x15] sm:$0x1] %vm741_vm10, %v889_v61 }
 0x26c   : > { %879 = vst.msk [vmem:[%s1441_s26 + $0x14] sm:$0x1] %vm741_vm10, %v857_v60 }
 0x271   : > { %v859_v62 = vpop.permute.xlu1 %858  ;;  %v863_v63 = vpop.permute.xlu0 %862 }
 0x272   : > { %880 = vst.msk [vmem:[%s1441_s26 + $0x24] sm:$0x1] %vm741_vm10, %v859_v62  ;;  %v895_v0 = vpop.permute.xlu2 %894 }
 0x273   : > { %914 = vst.msk [vmem:[%s1441_s26 + $0x45] sm:$0x1] %vm741_vm10, %v895_v0 }
 0x274   : > { %882 = vst.msk [vmem:[%s1441_s26 + $0x44] sm:$0x1] %vm741_vm10, %v863_v63 }
 0x279   : > { %v865_v1 = vpop.permute.xlu1 %864  ;;  %v869_v2 = vpop.permute.xlu0 %868 }
 0x27a   : > { %883 = vst.msk [vmem:[%s1441_s26 + $0x54] sm:$0x1] %vm741_vm10, %v865_v1  ;;  %v901_v3 = vpop.permute.xlu2 %900 }
 0x27b   : > { %917 = vst.msk [vmem:[%s1441_s26 + $0x75] sm:$0x1] %vm741_vm10, %v901_v3 }
 0x27c   : > { %885 = vst.msk [vmem:[%s1441_s26 + $0x74] sm:$0x1] %vm741_vm10, %v869_v2 }
 0x281   : > { %v893_v4 = vpop.permute.xlu1 %892  ;;  %v891_v5 = vpop.permute.xlu0 %890 }
 0x282   : > { %913 = vst.msk [vmem:[%s1441_s26 + $0x35] sm:$0x1] %vm741_vm10, %v893_v4  ;;  %v923_v6 = vpop.permute.xlu2 %922 }
 0x283   : > { %944 = vst.msk [vmem:[%s1441_s26 + $0x26] sm:$0x1] %vm741_vm10, %v923_v6 }
 0x284   : > { %912 = vst.msk [vmem:[%s1441_s26 + $0x25] sm:$0x1] %vm741_vm10, %v891_v5 }
 0x289   : > { %v899_v7 = vpop.permute.xlu1 %898  ;;  %v897_v8 = vpop.permute.xlu0 %896 }
 0x28a   : > { %916 = vst.msk [vmem:[%s1441_s26 + $0x65] sm:$0x1] %vm741_vm10, %v899_v7  ;;  %v929_v9 = vpop.permute.xlu2 %928 }
 0x28b   : > { %947 = vst.msk [vmem:[%s1441_s26 + $0x56] sm:$0x1] %vm741_vm10, %v929_v9 }
 0x28c   : > { %915 = vst.msk [vmem:[%s1441_s26 + $0x55] sm:$0x1] %vm741_vm10, %v897_v8 }
 0x291   : > { %v921_v10 = vpop.permute.xlu1 %920  ;;  %v925_v11 = vpop.permute.xlu0 %924 }
 0x292   : > { %943 = vst.msk [vmem:[%s1441_s26 + $0x16] sm:$0x1] %vm741_vm10, %v921_v10  ;;  %v957_v12 = vpop.permute.xlu2 %956 }
 0x293   : > { %977 = vst.msk [vmem:[%s1441_s26 + $0x37] sm:$0x1] %vm741_vm10, %v957_v12 }
 0x294   : > { %945 = vst.msk [vmem:[%s1441_s26 + $0x36] sm:$0x1] %vm741_vm10, %v925_v11 }
 0x299   : > { %v927_v13 = vpop.permute.xlu1 %926  ;;  %v931_v14 = vpop.permute.xlu0 %930 }
 0x29a   : > { %946 = vst.msk [vmem:[%s1441_s26 + $0x46] sm:$0x1] %vm741_vm10, %v927_v13  ;;  %v963_v15 = vpop.permute.xlu2 %962 }
 0x29b   : > { %980 = vst.msk [vmem:[%s1441_s26 + $0x67] sm:$0x1] %vm741_vm10, %v963_v15 }
 0x29c   : > { %948 = vst.msk [vmem:[%s1441_s26 + $0x66] sm:$0x1] %vm741_vm10, %v931_v14 }
 0x2a1   : > { %v933_v16 = vpop.permute.xlu1 %932  ;;  %v953_v17 = vpop.permute.xlu0 %952 }
 0x2a2   : > { %949 = vst.msk [vmem:[%s1441_s26 + $0x76] sm:$0x1] %vm741_vm10, %v933_v16  ;;  %v1152_v18 = vpop.permute.xlu2 %1151 }
 0x2a3   : > { %1170 = vst.msk [vmem:[%s1441_s26 + $0x5d] sm:$0x1] %vm741_vm10, %v1152_v18 }
 0x2a4   : > { %975 = vst.msk [vmem:[%s1441_s26 + $0x17] sm:$0x1] %vm741_vm10, %v953_v17 }
 0x2a9   : > { %v955_v19 = vpop.permute.xlu1 %954  ;;  %v959_v20 = vpop.permute.xlu0 %958 }
 0x2aa   : > { %976 = vst.msk [vmem:[%s1441_s26 + $0x27] sm:$0x1] %vm741_vm10, %v955_v19 }
 0x2ab   : > { %978 = vst.msk [vmem:[%s1441_s26 + $0x47] sm:$0x1] %vm741_vm10, %v959_v20 }
 0x2b1   : > { %v961_v21 = vpop.permute.xlu1 %960  ;;  %v965_v22 = vpop.permute.xlu0 %964 }
 0x2b2   : > { %979 = vst.msk [vmem:[%s1441_s26 + $0x57] sm:$0x1] %vm741_vm10, %v961_v21 }
 0x2b3   : > { %981 = vst.msk [vmem:[%s1441_s26 + $0x77] sm:$0x1] %vm741_vm10, %v965_v22 }
 0x2b9   : > { %v1156_v23 = vpop.permute.xlu1 %1155  ;;  %v1154_v25 = vpop.permute.xlu0 %1153 }
 0x2ba   : > { %1172 = vst.msk [vmem:[%s1441_s26 + $0x7d] sm:$0x1] %vm741_vm10, %v1156_v23 }
 0x2bb   : > { %1171 = vst.msk [vmem:[%s1441_s26 + $0x6d] sm:$0x1] %vm741_vm10, %v1154_v25 }
 0x2bc PF: > { %s13_s12 = sadd.s32 1, %s1315_s12  }
 0x2bd   : > { %p10_p4 = scmp.ge.s32.totalorder %s13_s12, 4  }
 0x2bf   :  { %12 = sbr.rel (!%p10_p4) target bundleno = 1 (0x1), region = 70 }

</bundles_post_ra>
